<compile_context>
chip_gen: v5e
topology: v5e:2x2
jax: 0.10.0
libtpu: 0.0.40
codegen_flags: <defaults>
</compile_context>

<pallas_src>
import functools

import jax
import jax.numpy as jnp
from jax import lax
from jax.experimental import pallas as pl
from jax.experimental.pallas import tpu as pltpu

_LANE = 128        # TPU lane width
_ACC_LANES = 512   # lane-wise accumulator width (pure-VPU accumulation)


def _round_down(x, m):
    return (x // m) * m


def _vmem_capacity_bytes():
    """Physical VMEM per core; conservative fallback if the query is unavailable."""
    try:
        info = pltpu.get_tpu_info()
        cap = getattr(info, "vmem_capacity_bytes", None)
        if cap:
            return int(cap)
    except Exception:
        pass
    return 64 << 20  # v7x-sized fallback (safe on every generation)


def _clamp_vmem(need, cap):
    return int(min(max(int(need), 16 << 20), int(0.85 * cap), 128 << 20))


# ---------------------------------------------------------------------------
# Shared squeeze-excite MLP: sigmoid(fc2(relu(fc1(avg))) + fc2(relu(fc1(max))))
# run as one stacked matmul pair.
# ---------------------------------------------------------------------------
def _squeeze_excite(avg, mx, w1, w2):
    # avg, mx: (1, C) f32;  w1: (Cr, C);  w2: (C, Cr)
    v = jnp.concatenate([avg, mx], axis=0)                        # (2, C)
    dn = (((1,), (1,)), ((), ()))                                 # contract feature dim
    h = lax.dot_general(v, w1, dn, precision=lax.Precision.HIGHEST,
                        preferred_element_type=jnp.float32)       # (2, Cr)
    h = jnp.maximum(h, 0.0)
    logits = lax.dot_general(h, w2, dn, precision=lax.Precision.HIGHEST,
                             preferred_element_type=jnp.float32)  # (2, C)
    return jax.nn.sigmoid(logits[0:1] + logits[1:2])              # (1, C)


# ---------------------------------------------------------------------------
# Fused single-pass kernel: one image resident in VMEM.
# ---------------------------------------------------------------------------
def _fused_kernel(x_ref, w1_ref, w2_ref, o_ref, *, hw):
    x = x_ref[...]                                   # (1, C, HW), native dtype
    xf = x.astype(jnp.float32)

    # Lane-wise (pure VPU) partial accumulation when HW is 128-aligned; one
    # cross-lane XLU reduce at the end. Ragged HW falls back to direct reduce.
    if hw % _LANE == 0 and hw > _LANE:
        s = xf[:, :, :_LANE]
        m = xf[:, :, :_LANE]
        for j in range(1, hw // _LANE):
            c = xf[:, :, j * _LANE:(j + 1) * _LANE]
            s = s + c
            m = jnp.maximum(m, c)
    else:
        s, m = xf, xf
    avg = jnp.sum(s, axis=-1) * (1.0 / hw)           # (1, C)
    mx = jnp.max(m, axis=-1)                         # (1, C)

    scale = _squeeze_excite(avg, mx,
                            w1_ref[...].astype(jnp.float32),
                            w2_ref[...].astype(jnp.float32))       # (1, C)
    o_ref[...] = x * scale[..., None].astype(o_ref.dtype)


# ---------------------------------------------------------------------------
# Two-pass path, pass 1: tiled pooling + MLP -> per-(image, channel) scale.
# ---------------------------------------------------------------------------
def _pool_mlp_kernel(x_ref, w1_ref, w2_ref, scale_ref, sum_acc, max_acc,
                     *, hw, lane_tile, chunk, last_valid):
    # x_ref:     (1, C, lane_tile)  one image, one spatial tile
    # scale_ref: (1, C, 1)          sigmoid(mlp(avg) + mlp(max))
    # sum_acc / max_acc: (1, C, chunk) lane-wise f32 accumulators (VPU only)
    k = pl.program_id(1)
    last = pl.num_programs(1) - 1
    n_chunks = lane_tile // chunk

    @pl.when(k == 0)
    def _():
        sum_acc[...] = jnp.zeros_like(sum_acc)
        max_acc[...] = jnp.full_like(max_acc, -jnp.inf)

    x = x_ref[...].astype(jnp.float32)

    def accumulate(valid_lanes):
        # valid_lanes is a static Python int -> mask only where actually needed.
        s = sum_acc[...]
        m = max_acc[...]
        for j in range(n_chunks):
            lo = j * chunk
            if lo >= valid_lanes:
                break                                   # fully padded chunk
            c = x[:, :, lo:lo + chunk]
            if lo + chunk > valid_lanes:                # partial chunk: static mask
                lane = lax.broadcasted_iota(jnp.int32, (1, 1, chunk), 2)
                ok = lane < (valid_lanes - lo)
                s = s + jnp.where(ok, c, 0.0)
                m = jnp.maximum(m, jnp.where(ok, c, -jnp.inf))
            else:
                s = s + c
                m = jnp.maximum(m, c)
        sum_acc[...] = s
        max_acc[...] = m

    if last_valid == lane_tile:          # HW divisible by the tile: never mask
        accumulate(lane_tile)
    else:
        @pl.when(k != last)
        def _():
            accumulate(lane_tile)

        @pl.when(k == last)
        def _():
            accumulate(last_valid)

    @pl.when(k == last)
    def _():
        avg = jnp.sum(sum_acc[...], axis=-1) * (1.0 / hw)          # (1, C)
        mx = jnp.max(max_acc[...], axis=-1)                        # (1, C)
        scale = _squeeze_excite(avg, mx,
                                w1_ref[...].astype(jnp.float32),
                                w2_ref[...].astype(jnp.float32))
        scale_ref[...] = scale[..., None]                          # (1, C, 1)


# ---------------------------------------------------------------------------
# Two-pass path, pass 2: x * scale, tile by tile, fully parallel.
# ---------------------------------------------------------------------------
def _scale_kernel(x_ref, scale_ref, o_ref):
    s = scale_ref[...].astype(o_ref.dtype)     # (1, C, 1) — tiny one-time cast
    o_ref[...] = x_ref[...] * s                # native-dtype multiply (bf16 stays bf16)


# ---------------------------------------------------------------------------
# Wrapper
# ---------------------------------------------------------------------------
def channel_attention(x, w1, w2, *, force_two_pass=False, _tile_lanes_override=None):
    """ChannelAttention forward. x: (B, C, H, W); w1: (C//r, C); w2: (C, C//r)."""
    B, C, H, W = x.shape
    Cr = w1.shape[0]
    HW = H * W
    elt = jnp.dtype(x.dtype).itemsize

    vmem_cap = _vmem_capacity_bytes()
    w_bytes = (w1.size * jnp.dtype(w1.dtype).itemsize
               + w2.size * jnp.dtype(w2.dtype).itemsize)

    x2 = x.reshape(B, C, HW)   # free layout-preserving reshape, no copy

    # ---- Fused single-pass fast path ---------------------------------------
    slab_in = C * HW * elt
    slab_f32 = C * HW * 4
    fused_need = 4 * slab_in + 2 * slab_f32 + w_bytes + (2 << 20)
    use_fused = (HW < _LANE) or (not force_two_pass and
                                 fused_need <= int(0.75 * vmem_cap))

    if use_fused:
        out = pl.pallas_call(
            functools.partial(_fused_kernel, hw=HW),
            out_shape=jax.ShapeDtypeStruct((B, C, HW), x.dtype),
            grid_spec=pltpu.PrefetchScalarGridSpec(
                num_scalar_prefetch=0,
                grid=(B,),
                in_specs=[
                    pl.BlockSpec((1, C, HW), lambda b: (b, 0, 0)),
                    pl.BlockSpec((Cr, C), lambda b: (0, 0)),
                    pl.BlockSpec((C, Cr), lambda b: (0, 0)),
                ],
                out_specs=pl.BlockSpec((1, C, HW), lambda b: (b, 0, 0)),
            ),
            compiler_params=pltpu.CompilerParams(
                dimension_semantics=("parallel",),
                vmem_limit_bytes=_clamp_vmem(fused_need + (2 << 20), vmem_cap),
            ),
            cost_estimate=pl.CostEstimate(
                flops=4 * B * C * HW + 8 * B * C * Cr,
                transcendentals=2 * B * C,
                bytes_accessed=2 * B * C * HW * elt + B * w_bytes,
            ),
        )(x2, w1, w2)
        return out.reshape(B, C, H, W)

    # ---- Two-pass tiled path (large feature maps) ---------------------------
    # Generation-aware tile budget: ~4 MiB on v7x (64 MiB VMEM), ~8 MiB on
    # v5e/v6e (128 MiB). One image per block keeps the batch axis parallel.
    tile_budget = max(2 << 20, min(8 << 20, vmem_cap // 16))
    lanes_budget = max(_LANE, _round_down(tile_budget // (C * elt), _LANE))
    lanes_budget = min(lanes_budget, 256 * _LANE)       # bound static unroll length
    if _tile_lanes_override is not None:
        lanes_budget = _tile_lanes_override
    T = min(lanes_budget, _round_down(HW, _LANE))       # T <= HW, multiple of 128
    if T > _ACC_LANES:
        T = _round_down(T, _ACC_LANES)
        chunk = _ACC_LANES
    else:
        chunk = T
    n_t = -(-HW // T)                                   # ceil division
    last_valid = HW - (n_t - 1) * T                     # valid lanes in last tile

    tile_bytes = C * T * elt
    vmem_pass1 = _clamp_vmem(3 * tile_bytes + 2 * C * chunk * 4 + w_bytes + (4 << 20),
                             vmem_cap)
    vmem_pass2 = _clamp_vmem(5 * tile_bytes + (4 << 20), vmem_cap)

    # Pass 1: pooled stats + MLP -> (B, C, 1) scale.
    scale = pl.pallas_call(
        functools.partial(_pool_mlp_kernel, hw=HW, lane_tile=T,
                          chunk=chunk, last_valid=last_valid),
        out_shape=jax.ShapeDtypeStruct((B, C, 1), jnp.float32),
        grid_spec=pltpu.PrefetchScalarGridSpec(
            num_scalar_prefetch=0,
            grid=(B, n_t),
            in_specs=[
                pl.BlockSpec((1, C, T), lambda b, k: (b, 0, k)),
                pl.BlockSpec((Cr, C), lambda b, k: (0, 0)),
                pl.BlockSpec((C, Cr), lambda b, k: (0, 0)),
            ],
            out_specs=pl.BlockSpec((1, C, 1), lambda b, k: (b, 0, 0)),
            scratch_shapes=[
                pltpu.VMEM((1, C, chunk), jnp.float32),   # lane-wise running sum
                pltpu.VMEM((1, C, chunk), jnp.float32),   # lane-wise running max
            ],
        ),
        compiler_params=pltpu.CompilerParams(
            dimension_semantics=("parallel", "arbitrary"),
            vmem_limit_bytes=vmem_pass1,
        ),
        cost_estimate=pl.CostEstimate(
            flops=2 * B * C * HW + 8 * B * C * Cr,
            transcendentals=2 * B * C,
            bytes_accessed=B * C * HW * elt + B * w_bytes + B * C * 4,
        ),
    )(x2, w1, w2)

    # Pass 2: x * scale.
    out = pl.pallas_call(
        _scale_kernel,
        out_shape=jax.ShapeDtypeStruct((B, C, HW), x.dtype),
        grid_spec=pltpu.PrefetchScalarGridSpec(
            num_scalar_prefetch=0,
            grid=(B, n_t),
            in_specs=[
                pl.BlockSpec((1, C, T), lambda b, t: (b, 0, t)),
                pl.BlockSpec((1, C, 1), lambda b, t: (b, 0, 0)),
            ],
            out_specs=pl.BlockSpec((1, C, T), lambda b, t: (b, 0, t)),
        ),
        compiler_params=pltpu.CompilerParams(
            dimension_semantics=("parallel", "parallel"),
            vmem_limit_bytes=vmem_pass2,
        ),
        cost_estimate=pl.CostEstimate(
            flops=B * C * HW,
            transcendentals=0,
            bytes_accessed=2 * B * C * HW * elt + B * C * 4,
        ),
    )(x2, scale)

    return out.reshape(B, C, H, W)


# ---------------------------------------------------------------------------
# Pure-JAX reference matching the PyTorch forward.
# ---------------------------------------------------------------------------
def channel_attention_ref(x, w1, w2):
    avg = jnp.mean(x, axis=(2, 3))          # (B, C)
    mx = jnp.max(x, axis=(2, 3))            # (B, C)

    def mlp(v):
        h = jnp.maximum(jnp.dot(v, w1.T, precision=lax.Precision.HIGHEST), 0.0)
        return jnp.dot(h, w2.T, precision=lax.Precision.HIGHEST)

    scale = jax.nn.sigmoid(mlp(avg) + mlp(mx))       # (B, C)
    return x * scale[:, :, None, None]


if __name__ == "__main__":
    B, C, reduction = 2, 32, 16
    Cr = C // reduction

    key = jax.random.PRNGKey(0)
    kx, k1, k2, kx2, kx3 = jax.random.split(key, 5)
    # Conv2d 1x1 (bias=False) weights, laid out (out, in).
    w1 = jax.random.normal(k1, (Cr, C), dtype=jnp.float32) * 0.1
    w2 = jax.random.normal(k2, (C, Cr), dtype=jnp.float32) * 0.1

    def check(xin, name, **kw):
        out = jax.block_until_ready(channel_attention(xin, w1, w2, **kw))
        ref = channel_attention_ref(xin, w1, w2)
        assert out.shape == xin.shape, name
        err = float(jnp.max(jnp.abs(out - ref)))
        assert jnp.allclose(out, ref, atol=1e-4, rtol=1e-4), f"mismatch {name}: {err}"

    # Fused single-pass path, 128-aligned spatial size.
    x_a = jax.random.normal(kx, (B, C, 16, 16), dtype=jnp.float32)
    check(x_a, "fused/aligned")

    # Fused path, ragged spatial size (HW = 81).
    x_b = jax.random.normal(kx2, (B, C, 9, 9), dtype=jnp.float32)
    check(x_b, "fused/ragged")

    # Two-pass tiled path (forced), aligned HW -> two full 128-lane tiles,
    # exercises cross-tile lane-wise accumulation.
    check(x_a, "two-pass/aligned", force_two_pass=True, _tile_lanes_override=128)

    # Two-pass tiled path (forced), ragged HW=144 -> partial last tile
    # (masked reduce + dropped OOB output writes).
    x_c = jax.random.normal(kx3, (B, C, 12, 12), dtype=jnp.float32)
    check(x_c, "two-pass/ragged", force_two_pass=True, _tile_lanes_override=128)

    print("KERNEL_OK")
</pallas_src>

<mosaic_0001>
module attributes {stable_mosaic.version = 11 : i64} {
  func.func @_fused_kernel(%arg0: i32, %arg1: memref<1x32x256xf32, #tpu.memory_space<vmem>>, %arg2: memref<2x32xf32, #tpu.memory_space<vmem>>, %arg3: memref<32x2xf32, #tpu.memory_space<vmem>>, %arg4: memref<1x32x256xf32, #tpu.memory_space<vmem>>) attributes {dimension_semantics = [#tpu.dimension_semantics<parallel>], iteration_bounds = array<i64: 2>, scalar_prefetch = 0 : i64, scratch_operands = 0 : i64, tpu.core_type = #tpu.core_type<tc>, window_params = [{transform_indices = @transform_0, window_bounds = array<i64: 1, 32, 256>}, {pipeline_mode = #tpu.pipeline_mode<synchronous>, transform_indices = @transform_1, window_bounds = array<i64: 2, 32>}, {pipeline_mode = #tpu.pipeline_mode<synchronous>, transform_indices = @transform_2, window_bounds = array<i64: 32, 2>}, {transform_indices = @transform_3, window_bounds = array<i64: 1, 32, 256>}]} {
    %c0 = arith.constant 0 : index
    %c0_0 = arith.constant 0 : index
    %c0_1 = arith.constant 0 : index
    %0 = vector.load %arg1[%c0, %c0_0, %c0_1] : memref<1x32x256xf32, #tpu.memory_space<vmem>>, vector<1x32x256xf32>
    %1 = vector.extract_strided_slice %0 {offsets = [0, 0, 0], sizes = [1, 32, 128], strides = [1, 1, 1]} : vector<1x32x256xf32> to vector<1x32x128xf32>
    %2 = vector.extract_strided_slice %0 {offsets = [0, 0, 0], sizes = [1, 32, 128], strides = [1, 1, 1]} : vector<1x32x256xf32> to vector<1x32x128xf32>
    %3 = vector.extract_strided_slice %0 {offsets = [0, 0, 128], sizes = [1, 32, 128], strides = [1, 1, 1]} : vector<1x32x256xf32> to vector<1x32x128xf32>
    %4 = arith.addf %1, %3 : vector<1x32x128xf32>
    %5 = arith.maximumf %2, %3 : vector<1x32x128xf32>
    %cst = arith.constant dense<0.000000e+00> : vector<1x32xf32>
    %6 = vector.multi_reduction <add>, %4, %cst [2] : vector<1x32x128xf32> to vector<1x32xf32>
    %cst_2 = arith.constant 3.906250e-03 : f32
    %7 = vector.broadcast %cst_2 : f32 to vector<1x32xf32>
    %8 = arith.mulf %6, %7 : vector<1x32xf32>
    %cst_3 = arith.constant dense<0xFF800000> : vector<1x32xf32>
    %9 = vector.multi_reduction <maximumf>, %5, %cst_3 [2] : vector<1x32x128xf32> to vector<1x32xf32>
    %c0_4 = arith.constant 0 : index
    %c0_5 = arith.constant 0 : index
    %10 = vector.load %arg2[%c0_4, %c0_5] : memref<2x32xf32, #tpu.memory_space<vmem>>, vector<2x32xf32>
    %c0_6 = arith.constant 0 : index
    %c0_7 = arith.constant 0 : index
    %11 = vector.load %arg3[%c0_6, %c0_7] : memref<32x2xf32, #tpu.memory_space<vmem>>, vector<32x2xf32>
    %12 = tpu.concatenate %8, %9 in 0 : vector<1x32xf32>, vector<1x32xf32> -> vector<2x32xf32>
    %cst_8 = arith.constant dense<0.000000e+00> : vector<2x2xf32>
    %13 = tpu.matmul %12, %10, %cst_8 {dimension_numbers = #tpu.dot_dimension_numbers<[1], [1], [0], [0], [0, 0, 1, 0], [], []>, precision = #tpu.contract_precision<fp32>} : vector<2x32xf32>, vector<2x32xf32>, vector<2x2xf32> -> vector<2x2xf32>
    %cst_9 = arith.constant 0.000000e+00 : f32
    %14 = vector.broadcast %cst_9 : f32 to vector<2x2xf32>
    %15 = arith.maximumf %13, %14 : vector<2x2xf32>
    %cst_10 = arith.constant dense<0.000000e+00> : vector<2x32xf32>
    %16 = tpu.matmul %15, %11, %cst_10 {dimension_numbers = #tpu.dot_dimension_numbers<[1], [1], [0], [0], [0, 0, 1, 0], [], []>, precision = #tpu.contract_precision<fp32>} : vector<2x2xf32>, vector<32x2xf32>, vector<2x32xf32> -> vector<2x32xf32>
    %17 = vector.extract_strided_slice %16 {offsets = [0, 0], sizes = [1, 32], strides = [1, 1]} : vector<2x32xf32> to vector<1x32xf32>
    %18 = vector.extract_strided_slice %16 {offsets = [1, 0], sizes = [1, 32], strides = [1, 1]} : vector<2x32xf32> to vector<1x32xf32>
    %19 = arith.addf %17, %18 : vector<1x32xf32>
    %20 = arith.negf %19 : vector<1x32xf32>
    %21 = math.exp %20 : vector<1x32xf32>
    %cst_11 = arith.constant 1.000000e+00 : f32
    %22 = vector.broadcast %cst_11 : f32 to vector<1x32xf32>
    %23 = arith.addf %22, %21 : vector<1x32xf32>
    %24 = arith.divf %22, %23 : vector<1x32xf32>
    %25 = vector.shape_cast %24 : vector<1x32xf32> to vector<1x32x1xf32>
    %26 = vector.broadcast %25 : vector<1x32x1xf32> to vector<1x32x256xf32>
    %27 = arith.mulf %0, %26 : vector<1x32x256xf32>
    %c0_12 = arith.constant 0 : index
    %c0_13 = arith.constant 0 : index
    %c0_14 = arith.constant 0 : index
    %28 = vector.load %arg4[%c0_12, %c0_13, %c0_14] : memref<1x32x256xf32, #tpu.memory_space<vmem>>, vector<1x32x256xf32>
    tpu.vector_store %arg4[%c0_12, %c0_13, %c0_14], %27 {strides = array<i32>} : memref<1x32x256xf32, #tpu.memory_space<vmem>>, vector<1x32x256xf32>,
    return
  }
  func.func @transform_0(%arg0: i32) -> (i32, i32, i32) {
    %c0_i32 = arith.constant 0 : i32
    %c0_i32_0 = arith.constant 0 : i32
    %c0_i32_1 = arith.constant 0 : i32
    return %arg0, %c0_i32, %c0_i32_0 : i32, i32, i32
  }
  func.func @transform_1(%arg0: i32) -> (i32, i32) {
    %c0_i32 = arith.constant 0 : i32
    %c0_i32_0 = arith.constant 0 : i32
    %c0_i32_1 = arith.constant 0 : i32
    return %c0_i32, %c0_i32_0 : i32, i32
  }
  func.func @transform_2(%arg0: i32) -> (i32, i32) {
    %c0_i32 = arith.constant 0 : i32
    %c0_i32_0 = arith.constant 0 : i32
    %c0_i32_1 = arith.constant 0 : i32
    return %c0_i32, %c0_i32_0 : i32, i32
  }
  func.func @transform_3(%arg0: i32) -> (i32, i32, i32) {
    %c0_i32 = arith.constant 0 : i32
    %c0_i32_0 = arith.constant 0 : i32
    %c0_i32_1 = arith.constant 0 : i32
    return %arg0, %c0_i32, %c0_i32_0 : i32, i32, i32
  }
}

</mosaic_0001>

<bundles_post_ra>
// kernel: tpu_custom_call.1
= control target key start
LH: loop header
LB: loop body
LE: loop exit
PB: predicated region body
PF: predicated region fallthrough
CT: control target
= control target key end

     0   :  { %8 = vsyncpa [#allocation3], 0  ;;  %s1167_s0 = inlined_call_operand.hbm [shape: f32[2,32,256], index: 0, kind: input, shape index: {}]   ;;  %s1168_s1 = inlined_call_operand.vmem [shape: f32[2,32], index: 1, kind: input, shape index: {}]   ;;  %s1169_s2 = inlined_call_operand.vmem [shape: f32[32,2], index: 2, kind: input, shape index: {}]   ;;  %s1170_s3 = inlined_call_operand.hbm [shape: f32[2,32,256], index: 3, kind: output, shape index: {}]  }
   0x1   :  { %10 = vsyncpa [#allocation3 + $0x1], 0 }
   0x2   :  { %11 = vsyncpa [#allocation4], 0 }
   0x3   :  { %13 = vsyncpa [#allocation4 + $0x1], 0  ;;  %s972_s12 = smov 0   ;;  %s974_s13 = smov 0  }
   0x4   :  { %s976_s14 = smov 0   ;;  %s978_s15 = smov 0  }
   0x5 LB: > { %s993_s16 = sadd.s32 4294967295, %s946_s15   ;;  %s774_s17 = sadd.s32 4294967294, %s946_s15   ;;  %s946_s15 = sphi %s978_s15, %s1180_s15   ;;  %s942_s14 = sphi %s976_s14, %s1179_s14   ;;  %s938_s13 = sphi %s974_s13, %s1178_s13   ;;  %s934_s12 = sphi %s972_s12, %s1177_s12  }
   0x6   : > { %s997_s18 = sadd.s32 1, %s946_s15   ;;  %s26_s19 = sadd.s32 1, %s942_s14 }
   0x7   : > { %s23_s20 = ssub.s32 %s946_s15, %s997_s18  ;;  %p33_p0 = scmp.ne.s32.totalorder %s942_s14, %s938_s13 }
   0x8   : > { %p24_p1 = scmp.eq.s32.totalorder %s23_s20, 0  ;;  %p34_p2 = scmp.eq.s32.totalorder %s946_s15, 0 }
   0x9   : > { %p39_p3 = scmp.ne.s32.totalorder %s938_s13, %s934_s12  ;;  %p40_p4 = scmp.eq.s32.totalorder %s993_s16, 0 }
   0xa   : > { %s1009_s21 = scalar_select %p24_p1, %s942_s14, %s26_s19  }
   0xb   : > { %p1011_p5 = por %p34_p2, %p33_p0  ;;  %p1015_p6 = por %p40_p4, %p39_p3 }
   0xc   : > { %p105_p7 = scmp.eq.s32.totalorder %s993_s16, 1  ;;  %p111_p8 = scmp.eq.s32.totalorder %s774_s17, 1 }
   0xd   : > { %p803_p10 = scmp.lt.s32.totalorder %s946_s15, 2  ;;  %s137_s26 = sand.u32 1, %s942_s14  }
   0xe   : > { %p1022_p11 = por %p105_p7, %p33_p0  ;;  %p1026_p12 = por %p111_p8, %p39_p3 }
   0xf   : > { %s789_s27 = sshll.u32 %s946_s15, 6  ;;  %s777_s28 = sshll.u32 %s137_s26, 6 }
  0x10   : > { %s146_s4 = scalar_lea.hbm %s1167_s0, %s789_s27  ;;  %s141_s6 = scalar_lea.vmem [#allocation2], %s777_s28 }
  0x11   : > { %s147_s5 = sshll.u32 %s146_s4, 4  ;;  %s149_s7 = sshll.u32 %s141_s6, 4  ;;  %s148_s5 = int_to_ptr.hbm [resolvable:$true] %s147_s5  ;;  %s150_s7 = int_to_ptr.vmem [resolvable:$true] %s149_s7 }
  0x12   : > { %p1037_p13 = pnand %p803_p10, %p1011_p5  ;;  %p780_p0 = scmp.ge.s32.totalorder %s946_s15, 1 }
  0x13   : > { %p157_p1 = scmp.lt.s32.totalorder %s946_s15, 3  ;;  %s138_s9 = scalar_lea.sflag [#allocation3], %s137_s26 }
  0x14   : > { %s850_s10 = sshra.s32 %s148_s5, 4  ;;  %p854_p3 = pneg %p1037_p13  ;;  %s851_s10 = int_to_ptr.hbm [resolvable:$true] %s850_s10 }
  0x15   : > { %s852_s11 = scalar_lea.hbm %s851_s10, 64  ;;  %s857_s20 = scalar_lea.hbm %s1167_s0, 128 }
  0x16   : > { %p853_p2 = scmp.ne.s32.totalorder %s851_s10, %s852_s11  ;;  %p858_p5 = scmp.lt.s32.totalorder %s851_s10, %s1167_s0 }
  0x17   : > { %p859_p8 = scmp.lt.s32.totalorder %s857_s20, %s852_s11 }
  0x18   : > { %p855_p4 = pnand %p854_p3, %p853_p2 }
  0x19   : > { %p860_p10 = por %p859_p8, %p858_p5 }
  0x1a   : > { %p856_p7 = pneg %p855_p4 }
  0x1c   : > { %p861_p9 = pnand %p860_p10, %p856_p7 }
  0x1e   : > { %864 = shalt.err (!%p861_p9)
}
  0x1f   : > { %s948_s26 = smov 256   ;;  %s949_s28 = smov 16  }
  0x20   : > { %798 = dma.hbm_to_vmem [thread:$0]  (!%p1037_p13), %s148_s5, 1024, %s150_s7, %s138_s9, %s948_s26, %s948_s26, %s949_s28  }
  0x21   : > { %p158_p2 = pnand %p780_p0, %p157_p1 }
  0x22   : > { %s1058_s29 = sand.u32 (!%p158_p2), 1, %s938_s13  }
  0x23   : > { %161 = sbr.rel (%p158_p2) target bundleno = 645 (0x285), region = 32  ;;  %s781_s30 = sshll.u32 (!%p158_p2), %s1058_s29, 6 }
  0x24   : > { %s164_s4 = scalar_lea.sflag (!%p158_p2), [#allocation3], %s1058_s29  ;;  %s167_s6 = scalar_lea.vmem (!%p158_p2), [#allocation2], %s781_s30 }
  0x28   : > { %925 = dma.done.wait (%p1015_p6), %s164_s4, 1024  }
  0x29   : > { %927 = vsyncadd (%p1015_p6), %s164_s4, 4294966272  ;;  %v1068_v0 = vld [vmem:[%s167_s6] sm:$0xff]  ;;  %v1070_v1 = vld [vmem:[%s167_s6 + $0x8] sm:$0xff]  ;;  %vm266_vm0 = vcmask 261120   ;;  %v236_v26 = vlaneseq  ;;  %vm241_vm1 = vcmask 130112   ;;  %vm245_vm2 = vcmask 195712  }
  0x2a   : > { %v1072_v2 = vld [vmem:[%s167_s6 + $0x20] sm:$0xff]  ;;  %v203_v3 = vmax.f32 %v1068_v0, %v1070_v1  ;;  %v199_v4 = vadd.f32 %v1070_v1, %v1068_v0  ;;  %v1078_v5 = vld [vmem:[%s167_s6 + $0x28] sm:$0xff]  ;;  %v1082_v7 = vld [vmem:[%s167_s6 + $0x10] sm:$0xff]  ;;  %vm249_vm3 = vcmask 261312   ;;  %vm264_vm4 = vcmask 1040384   ;;  %s190_s22 = scalar_lea.vmem [#allocation5], %s781_s30 }
  0x2b   : > { %v201_v6 = vadd.f32 %v1078_v5, %v1072_v2  ;;  %v1084_v8 = vld [vmem:[%s167_s6 + $0x18] sm:$0xff]  ;;  %v1086_v9 = vld [vmem:[%s167_s6 + $0x30] sm:$0xff]  ;;  %v205_v14 = vmax.f32 %v1072_v2, %v1078_v5  ;;  %v227_v16 = vld [vmem:[%s1168_s1] sm:$0x3]  ;;  %v237_v27 = vand.u32 127, %v236_v26  ;;  %vm420_vm5 = vcmask 15360  }
  0x2c   : > { %219 = vmax.xlane.f32.xlu2 %v203_v3  ;;  %207 = vadd.xlane.f32.xlu0 %v199_v4  ;;  %v1088_v10 = vld [vmem:[%s167_s6 + $0x38] sm:$0xff]  ;;  %v204_v11 = vmax.f32 %v1082_v7, %v1084_v8  ;;  %v200_v12 = vadd.f32 %v1084_v8, %v1082_v7  ;;  %v271_v17 = vsel %vm266_vm0, %v227_v16, 0  ;;  %v230_v4 = vld [vmem:[%s1169_s2 + $0x10] sm:$0xff]  ;;  %s790_s27 = sshll.u32 %s993_s16, 6  ;;  %s698_s6 = sshll.u32 %s190_s22, 4  ;;  %s699_s6 = int_to_ptr.vmem [resolvable:$true] %s698_s6 }
  0x2d   : > { %211 = vadd.xlane.f32.xlu1 %v201_v6  ;;  %v202_v13 = vadd.f32 %v1088_v10, %v1086_v9  ;;  %v206_v15 = vmax.f32 %v1086_v9, %v1088_v10  ;;  %v288_v18 = vand.u32 4294901760, %v271_v17  ;;  %v239_v30 = vadd.s32 4294967288, %v237_v27  ;;  %v231_v61 = vld [vmem:[%s1169_s2 + $0x18] sm:$0xff]  ;;  %s697_s4 = scalar_lea.hbm %s1170_s3, %s790_s27  ;;  %s686_s16 = scalar_lea.sflag [#allocation4], %s1058_s29 }
  0x2e   : > { %v243_v33 = vadd.s32 4294967280, %v237_v27  ;;  %v247_v38 = vadd.s32 4294967272, %v237_v27  ;;  %v434_v62 = vsel %vm420_vm5, %v231_v61, 0  ;;  %s700_s23 = sshll.u32 %s697_s4, 4  ;;  %s900_s9 = scalar_lea.hbm %s1170_s3, 128  ;;  %s701_s23 = int_to_ptr.hbm [resolvable:$true] %s700_s23 }
  0x2f   : > { %v315_v19 = vsub.f32 %v271_v17, %v288_v18  ;;  %365 = vmatpush.xpose.msra.mxu3 %v288_v18  ;;  %289 = vmatpush.xpose.msra.mxu0 %v288_v18  ;;  %v448_v63 = vand.u32 4294901760, %v434_v62  ;;  %s894_s30 = sshra.s32 %s701_s23, 4  ;;  %s895_s30 = int_to_ptr.hbm [resolvable:$true] %s894_s30 }
  0x30   : > { %s896_s5 = scalar_lea.hbm %s895_s30, 64  ;;  %p901_p0 = scmp.lt.s32.totalorder %s895_s30, %s1170_s3 }
  0x31   : > { %v316_v20 = vand.u32 4294901760, %v315_v19  ;;  %342 = vmatpush.xpose.msra.mxu2 %v315_v19  ;;  %v478_v3 = vsub.f32 %v434_v62, %v448_v63  ;;  %p897_p6 = scmp.ne.s32.totalorder %s895_s30, %s896_s5  ;;  %p902_p1 = scmp.lt.s32.totalorder %s900_s9, %s896_s5 }
  0x33   : > { %v317_v21 = vsub.f32 %v315_v19, %v316_v20  ;;  %391 = vmatpush.xpose.msrb.mxu0 %v316_v20  ;;  %v479_v6 = vand.u32 4294901760, %v478_v3  ;;  %p898_p9 = pnand %p897_p6, %p1022_p11  ;;  %p903_p3 = por %p902_p1, %p901_p0 }
  0x34   : > { %221 = vmax.xlane.f32.xlu2 %v204_v11  ;;  %209 = vadd.xlane.f32.xlu0 %v200_v12  ;;  %v431_v11 = vsel %vm420_vm5, %v230_v4, 0 }
  0x35   : > { %213 = vadd.xlane.f32.xlu1 %v202_v13  ;;  %v318_v22 = vand.u32 4294901760, %v317_v21  ;;  %449 = vmatpush.xpose.msrb.mxu2 %v448_v63  ;;  %v450_v12 = vand.u32 4294901760, %v431_v11  ;;  %v480_v13 = vsub.f32 %v478_v3, %v479_v6  ;;  %p899_p13 = pneg %p898_p9 }
  0x37   : > { %319 = vmatpush.xpose.msra.mxu1 %v318_v22  ;;  %v481_v16 = vand.u32 4294901760, %v480_v13  ;;  %v228_v22 = vld [vmem:[%s1169_s2] sm:$0xff]  ;;  %p904_p4 = pnand %p903_p3, %p899_p13 }
  0x39   : > { %451 = vmatpush.xpose.msrb.mxu2 %v450_v12  ;;  %482 = vmatpush.xpose.msrb.mxu3 %v481_v16 }
  0x3b   : > { %413 = vmatpush.xpose.msrb.mxu1 %v288_v18 }
  0x3c   : > { %223 = vmax.xlane.f32.xlu0 %v205_v14  ;;  %v484_v14 = vsub.f32 %v431_v11, %v450_v12 }
  0x3d   : > { %225 = vmax.xlane.f32.xlu1 %v206_v15  ;;  %v229_v15 = vld [vmem:[%s1169_s2 + $0x8] sm:$0xff] }
  0x3e   : > { %v428_v17 = vsel %vm420_vm5, %v229_v15, 0  ;;  %v485_v18 = vand.u32 4294901760, %v484_v14 }
  0x3f   : > { %v452_v19 = vand.u32 4294901760, %v428_v17 }
  0x40   : > { %v486_v20 = vsub.f32 %v484_v14, %v485_v18 }
  0x41   : > { %v490_v21 = vsub.f32 %v428_v17, %v452_v19  ;;  %453 = vmatpush.xpose.msrb.mxu2 %v452_v19 }
  0x9f   : > { %v208_v23 = vpop.xlane.xlu0 %207  ;;  %v220_v24 = vpop.xlane.xlu2 %219 }
  0xa0   : > { %v212_v25 = vpop.xlane.xlu1 %211  ;;  %v215_v28 = vmul.f32 0.00390625, %v208_v23  ;;  %v256_v40 = vperm.slane %v220_v24, %v237_v27  ;;  %v425_v23 = vsel %vm420_vm5, %v228_v22, 0  ;;  %v487_v24 = vand.u32 4294901760, %v486_v20 }
  0xa1   : > { %v217_v34 = vmul.f32 0.00390625, %v212_v25  ;;  %v491_v25 = vand.u32 4294901760, %v490_v21 }
  0xa2   : > { %v238_v37 = vperm.slane %v215_v28, %v237_v27  ;;  %v454_v27 = vand.u32 4294901760, %v425_v23  ;;  %488 = vmatpush.xpose.msrb.mxu3 %v487_v24 }
  0xa3   : > { %v244_v43 = vperm.slane %v217_v34, %v243_v33  ;;  %v492_v28 = vsub.f32 %v490_v21, %v491_v25 }
  0xa4   : > { %455 = vmatpush.xpose.msrb.mxu2 %v454_v27 }
  0xa7   : > { %v210_v29 = vpop.xlane.xlu0 %209  ;;  %v222_v35 = vpop.xlane.xlu2 %221 }
  0xa8   : > { %v216_v31 = vmul.f32 0.00390625, %v210_v29  ;;  %v214_v32 = vpop.xlane.xlu1 %213  ;;  %v257_v41 = vperm.slane %v222_v35, %v239_v30  ;;  %v496_v29 = vsub.f32 %v425_v23, %v454_v27 }
  0xa9   : > { %v218_v39 = vmul.f32 0.00390625, %v214_v32 }
  0xaa   : > { %v240_v36 = vperm.slane %v216_v31, %v239_v30  ;;  %v258_v49 = vsel %vm241_vm1, %v257_v41, %v256_v40  ;;  %v493_v30 = vand.u32 4294901760, %v492_v28  ;;  %v497_v31 = vand.u32 4294901760, %v496_v29 }
  0xab   : > { %v248_v44 = vperm.slane %v218_v39, %v247_v38 }
  0xac   : > { %v242_v42 = vsel %vm241_vm1, %v240_v36, %v238_v37  ;;  %494 = vmatpush.xpose.msrb.mxu3 %v493_v30  ;;  %v498_v32 = vsub.f32 %v496_v29, %v497_v31 }
  0xad   : > { %v246_v46 = vsel %vm245_vm2, %v244_v43, %v242_v42 }
  0xae   : > { %v250_v52 = vsel %vm249_vm3, %v248_v44, %v246_v46 }
  0xaf   : > { %v224_v45 = vpop.xlane.xlu0 %223 }
  0xb0   : > { %v259_v47 = vperm.slane %v224_v45, %v243_v33  ;;  %v226_v48 = vpop.xlane.xlu1 %225  ;;  %v499_v33 = vand.u32 4294901760, %v498_v32 }
  0xb1   : > { %v261_v50 = vperm.slane %v226_v48, %v247_v38 }
  0xb2   : > { %v260_v51 = vsel %vm245_vm2, %v259_v47, %v258_v49  ;;  %500 = vmatpush.xpose.msrb.mxu3 %v499_v33 }
  0xb3   : > { %v262_v53 = vsel %vm249_vm3, %v261_v50, %v260_v51 }
  0xb4   : > { %v265_v54 = vsel %vm264_vm4, %v250_v52, %v262_v53  ;;  %v646_v52 = vshrl.u32 %v236_v26, 7 }
  0xb5   : > { %v268_v55 = vsel %vm266_vm0, %v265_v54, 0 }
  0xb6   : > { %v290_v56 = vand.u32 4294901760, %v268_v55  ;;  %841 = vset.pattern.permute.xlu2 %v646_v52  ;;  %v659_v53 = vadd.s32 16, %v646_v52  ;;  %v653_v54 = vadd.s32 8, %v646_v52 }
  0xb8   : > { %321 = vmatmul.f32.vlgmr.msra.gmra.mxu1 %v290_v56  ;;  %v291_v57 = vsub.f32 %v268_v55, %v290_v56  ;;  %843 = vset.pattern.permute.xlu1 %v659_v53 }
  0xb9   : > { %549 = vmatpush.xpose.msra.mxu1 %v448_v63  ;;  %842 = vset.pattern.permute.xlu0 %v653_v54 }
  0xba   : > { %345 = vmatmul.f32.vlgmr.msra.gmra.mxu2 %v291_v57  ;;  %v292_v58 = vand.u32 4294901760, %v291_v57 }
  0xbb   : > { %578 = vmatpush.xpose.msra.mxu2 %v479_v6 }
  0xbc   : > { %369 = vmatmul.f32.vlgmr.msra.gmra.mxu3 %v292_v58  ;;  %v293_v59 = vsub.f32 %v291_v57, %v292_v58 }
  0xbd   : > { %551 = vmatpush.xpose.msra.mxu1 %v450_v12  ;;  %609 = vmatpush.xpose.msra.mxu3 %v448_v63 }
  0xbe   : > { %v294_v60 = vand.u32 4294901760, %v293_v59 }
  0xbf   : > { %582 = vmatpush.xpose.msra.mxu2 %v485_v18 }
  0xc0   : > { %295 = vmatmul.f32.vlgmr.msra.gmra.mxu0 %v294_v60  ;;  %415 = vmatmul.f32.vlgmr.msrb.gmra.mxu1 %v290_v56 }
  0xc1   : > { %520 = vmatpush.xpose.msra.mxu0 %v478_v3  ;;  %553 = vmatpush.xpose.msra.mxu1 %v452_v19 }
  0xc2   : > { %611 = vmatpush.xpose.msra.mxu3 %v450_v12 }
  0xc3   : > { %586 = vmatpush.xpose.msra.mxu2 %v491_v25  ;;  %v665_v25 = vadd.s32 24, %v646_v52 }
  0xc5   : > { %523 = vmatpush.xpose.msra.mxu0 %v484_v14  ;;  %555 = vmatpush.xpose.msra.mxu1 %v454_v27 }
  0xc6   : > { %613 = vmatpush.xpose.msra.mxu3 %v452_v19 }
  0xc7   : > { %590 = vmatpush.xpose.msra.mxu2 %v497_v31 }
  0xc8   : > { %393 = vmatmul.f32.vlgmr.msrb.gmra.mxu0 %v290_v56 }
  0xc9   : > { %526 = vmatpush.xpose.msra.mxu0 %v490_v21 }
  0xca   : > { %615 = vmatpush.xpose.msra.mxu3 %v454_v27 }
  0xcd   : > { %529 = vmatpush.xpose.msra.mxu0 %v496_v29 }
 0x135   : > { %v322_v34 = vpop.f32.mrf.mxu1 }
 0x13d   : > { %v296_v35 = vpop.f32.mrf.mxu0  ;;  %v346_v37 = vpop.f32.mrf.mxu2 }
 0x13e   : > { %v323_v36 = vadd.f32 %v322_v34, %v296_v35  ;;  %v416_v43 = vpop.f32.mrf.mxu1 }
 0x13f   : > { %v370_v39 = vpop.f32.mrf.mxu3 }
 0x140   : > { %v347_v38 = vadd.f32 %v346_v37, %v323_v36 }
 0x142   : > { %v371_v40 = vadd.f32 %v370_v39, %v347_v38 }
 0x145   : > { %v394_v41 = vpop.f32.mrf.mxu0 }
 0x146   : > { %v395_v42 = vadd.f32 %v394_v41, %v371_v40 }
 0x148   : > { %v417_v44 = vadd.f32 %v416_v43, %v395_v42 }
 0x14a   : > { %v419_v45 = vmax.f32 %v417_v44, 0.0 }
 0x14c   : > { %v422_v46 = vsel %vm420_vm5, %v419_v45, 0 }
 0x14d   : > { %v456_v47 = vand.u32 4294901760, %v422_v46 }
 0x14f   : > { %v457_v48 = vsub.f32 %v422_v46, %v456_v47  ;;  %502 = vmatmul.f32.vlgmr.msrb.gmra.mxu3 %v456_v47 }
 0x151   : > { %532 = vmatmul.f32.vlgmr.msra.gmra.mxu0 %v457_v48  ;;  %v458_v49 = vand.u32 4294901760, %v457_v48 }
 0x153   : > { %559 = vmatmul.f32.vlgmr.msra.gmra.mxu1 %v458_v49  ;;  %v459_v50 = vsub.f32 %v457_v48, %v458_v49 }
 0x155   : > { %v460_v51 = vand.u32 4294901760, %v459_v50 }
 0x157   : > { %461 = vmatmul.f32.vlgmr.msrb.gmra.mxu2 %v460_v51  ;;  %617 = vmatmul.f32.vlgmr.msra.gmra.mxu3 %v456_v47 }
 0x15f   : > { %592 = vmatmul.f32.vlgmr.msra.gmra.mxu2 %v456_v47 }
 0x1ce   : > { %v533_v58 = vpop.f32.mrf.mxu0 }
 0x1d0   : > { %v560_v60 = vpop.f32.mrf.mxu1 }
 0x1d2   : > { %v503_v55 = vpop.f32.mrf.mxu3 }
 0x1da   : > { %v462_v56 = vpop.f32.mrf.mxu2  ;;  %v618_v3 = vpop.f32.mrf.mxu3 }
 0x1db   : > { %v504_v57 = vadd.f32 %v503_v55, %v462_v56 }
 0x1dd   : > { %v534_v59 = vadd.f32 %v533_v58, %v504_v57 }
 0x1df   : > { %v561_v61 = vadd.f32 %v560_v60, %v534_v59 }
 0x1e2   : > { %v593_v62 = vpop.f32.mrf.mxu2 }
 0x1e3   : > { %v594_v63 = vadd.f32 %v593_v62, %v561_v61 }
 0x1e5   : > { %v619_v4 = vadd.f32 %v618_v3, %v594_v63 }
 0x1e7   : > { %v622_v6 = vrot.slane %v619_v4, 1 }
 0x1e9   : > { %v624_v11 = vadd.f32 %v622_v6, %v619_v4 }
 0x1eb   : > { %v783_v12 = vmul.f32 -1.442695, %v624_v11 }
 0x1ed   : > { %846 = vpow2.f32 %v783_v12 }
 0x1f3   : > { %v847_v26 = vpop.eup %846 }
 0x1f4   : > { %v628_v13 = vadd.f32 1.0, %v847_v26 }
 0x1f6   : > { %848 = vrcp.f32 %v628_v13  ;;  %v640_v17 = vand.u32 2147483648, %v628_v13  ;;  %v638_v19 = vand.u32 2147483647, %v628_v13  ;;  %vm634_vm7 = vweird.f32 %v628_v13 }
 0x1f8   : > { %v641_v21 = vor.u32 1.1754944e-38, %v640_v17  ;;  %vm639_vm9 = vcmp.eq.f32.partialorder %v638_v19, 8.507059e+37 }
 0x1fc   : > { %v849_v14 = vpop.eup %848 }
 0x1fd   : > { %v630_v15 = vmul.f32 %v849_v14, %v628_v13  ;;  %vm635_vm6 = vweird.f32 %v849_v14 }
 0x1fe   : > { %vm636_vm8 = vmor %vm634_vm7, %vm635_vm6 }
 0x1ff   : > { %v631_v16 = vsub.f32 1.0, %v630_v15 }
 0x201   : > { %v632_v18 = vmul.f32 %v849_v14, %v631_v16 }
 0x203   : > { %v633_v20 = vadd.f32 %v849_v14, %v632_v18 }
 0x205   : > { %v637_v22 = vsel %vm636_vm8, %v849_v14, %v633_v20 }
 0x206   : > { %v642_v23 = vsel %vm639_vm9, %v641_v21, %v637_v22 }
 0x207   : > { %v644_v24 = vperm.slane %v642_v23, 0 }
 0x209   : > { %661 = vperm.xlu1 %843, %v644_v24   ;;  %655 = vperm.xlu0 %842, %v644_v24  }
 0x20a   : > { %649 = vperm.xlu2 %841, %v644_v24  }
 0x211   : > { %845 = vset.pattern.permute.xlu0 %v665_v25 }
 0x212   : > { %844 = vset.pattern.permute.xlu2 %v665_v25 }
 0x21a   : > { %667 = vperm.xlu2 %844, %v644_v24  }
 0x264   : > { %v650_v27 = vpop.permute.xlu2 %649 }
 0x265   : > { %v669_v28 = vmul.f32 %v650_v27, %v1068_v0  ;;  %v670_v29 = vmul.f32 %v650_v27, %v1070_v1 }
 0x267   : > { %677 = vst [vmem:[%s190_s22] sm:$0xff] %v669_v28 }
 0x268   : > { %678 = vst [vmem:[%s190_s22 + $0x8] sm:$0xff] %v670_v29 }
 0x274   : > { %v668_v30 = vpop.permute.xlu2 %667 }
 0x275   : > { %v675_v31 = vmul.f32 %v668_v30, %v1086_v9  ;;  %v676_v32 = vmul.f32 %v668_v30, %v1088_v10 }
 0x277   : > { %683 = vst [vmem:[%s190_s22 + $0x30] sm:$0xff] %v675_v31 }
 0x278   : > { %684 = vst [vmem:[%s190_s22 + $0x38] sm:$0xff] %v676_v32 }
 0x27b   : > { %v662_v0 = vpop.permute.xlu1 %661  ;;  %v656_v1 = vpop.permute.xlu0 %655 }
 0x27c   : > { %v673_v33 = vmul.f32 %v662_v0, %v1072_v2  ;;  %v674_v34 = vmul.f32 %v662_v0, %v1078_v5  ;;  %v671_v9 = vmul.f32 %v656_v1, %v1082_v7  ;;  %v672_v10 = vmul.f32 %v656_v1, %v1084_v8 }
 0x27e   : > { %681 = vst [vmem:[%s190_s22 + $0x20] sm:$0xff] %v673_v33 }
 0x27f   : > { %682 = vst [vmem:[%s190_s22 + $0x28] sm:$0xff] %v674_v34 }
 0x280   : > { %679 = vst [vmem:[%s190_s22 + $0x10] sm:$0xff] %v671_v9 }
 0x281   : > { %680 = vst [vmem:[%s190_s22 + $0x18] sm:$0xff] %v672_v10 }
 0x282   : > { %907 = shalt.err (!%p904_p4)
}
 0x283   : > { %s950_s29 = smov 256   ;;  %s951_s17 = smov 16  }
 0x284   : > { %793 = dma.vmem_to_hbm [thread:$0]  (%p1022_p11), %s699_s6, 1024, %s701_s23, %s686_s16, %s950_s29, %s950_s29, %s951_s17  }
 0x285 PF: > { %s715_s19 = sand.u32 1, %s934_s12   ;;  %p1176_p7 = scmp.ge.s32.totalorder %s946_s15, 2 }
 0x286   : > { %s716_s20 = scalar_lea.sflag [#allocation4], %s715_s19 }
 0x287   : > { %p800_p5 = pnand %p1176_p7, %p1026_p12 }
 0x289   : > { %p801_p8 = pneg %p800_p5 }
 0x28b   : > { %929 = dma.done.wait (%p801_p8), %s716_s20, 1024  }
 0x28c   : > { %931 = vsyncadd (%p801_p8), %s716_s20, 4294966272  ;;  %p16_p10 = scmp.ge.s32.totalorder %s997_s18, 4   ;;  %s1177_s12 = smov %s938_s13 }
 0x28d   : > { %s1178_s13 = smov %s942_s14  ;;  %s1179_s14 = smov %s1009_s21 }
 0x28e   : > { %s1180_s15 = smov %s997_s18  ;;  %18 = sbr.rel (!%p16_p10) target bundleno = 5 (0x5), region = 77 }
 0x293   :  { %722 = vsyncpa [#allocation3], 1 }
 0x294   :  { %724 = vsyncpa [#allocation3 + $0x1], 1 }
 0x295   :  { %725 = vsyncpa [#allocation4], 1 }
 0x296   :  { %727 = vsyncpa [#allocation4 + $0x1], 1 }

</bundles_post_ra>
